<compile_context>
chip_gen: v5e
topology: v5e:2x2
jax: 0.10.0
libtpu: 0.0.40
codegen_flags: <defaults>
</compile_context>

<pallas_src>
import math
import functools

import numpy as np
import jax
import jax.numpy as jnp
from jax.experimental import pallas as pl
from jax.experimental.pallas import tpu as pltpu


COMPUTE_DTYPE = jnp.bfloat16   # operand dtype for the O(N^2) streams (accumulation stays f32)
# TODO(synk): int8 (v5e/v6e) / fp8 (v7x) quantization of L_hat would halve the dominant HBM
# stream again but needs explicit accuracy validation; left at bf16 here.


def get_bern_coeff(degree):
    """Bernstein basis polynomial coefficients (same math as BernConv.get_bern_coeff)."""
    out = []
    for i in range(degree + 1):
        coefficients = [0] * i + [math.comb(degree, i)]
        first_term = np.polynomial.polynomial.Polynomial(coefficients)
        second_term = np.polynomial.polynomial.Polynomial([1, -1]) ** (degree - i)
        coef = (first_term * second_term).coef
        c = [0.0] * (degree + 1)
        for j, v in enumerate(coef):
            c[j] = float(v)
        out.append(c)
    return out


def _round_up(v, m):
    return ((v + m - 1) // m) * m


def _vmem_capacity_bytes():
    try:
        cap = getattr(pltpu.get_tpu_info(), "vmem_capacity_bytes", None)
        if cap:
            return int(cap)
    except Exception:
        pass
    return 64 << 20            # conservative fallback (v7x-sized VMEM)


def _pick_row_tile(np_, elem_bytes, budget):
    """Largest row tile (multiple of 128 dividing np_) whose (TR, NP) L slab fits `budget`."""
    for tr in (4096, 2048, 1024, 512, 256, 128):
        if np_ % tr == 0 and tr * np_ * elem_bytes <= budget:
            return tr
    # TODO(synk): for NP so large that even a 128-row full-width slab exceeds the budget, a
    # column-tiled (k, r, c) grid with a VMEM accumulator would be required.
    return 128


# ---------------- kernel 1: linear_transform_in (Linear -> ReLU -> Linear) ----------------

def linear_in_kernel(x_ref, w1_ref, b1_ref, w2_ref, b2_ref, o_ref):
    f32 = jnp.float32
    h = jnp.dot(x_ref[...], w1_ref[...], preferred_element_type=f32) + b1_ref[...]
    h = jnp.maximum(h, 0.0)
    o_ref[...] = (jnp.dot(h, w2_ref[...], preferred_element_type=f32)
                  + b2_ref[...]).astype(o_ref.dtype)


# -------- kernel 2: Bernstein propagation + per-filter attention -> res (N, hid) ---------

def prop_attn_kernel(K, F, NP, TR, compute_dtype,
                     xh_ref, l_ref, alpha_ref, wf_ref, bf_ref, wx_ref, bx_ref,
                     res_ref, bpow_ref):
    f32 = jnp.float32
    k = pl.program_id(0)                 # power step: this step computes L_hat^{k+1} xh
    r = pl.program_id(1)                 # row tile
    row0 = pl.multiple_of(r * TR, TR)

    # Power 0 (= xh) -> scratch slot 0, once.  The r == 0 matmul below needs the *full* slot 0,
    # so this cannot be a per-row-tile copy; it is a one-time COMPUTE_DTYPE VMEM->VMEM copy.
    @pl.when((k == 0) & (r == 0))
    def _():
        bpow_ref[pl.ds(0, NP), :] = xh_ref[...]

    # rows [row0, row0 + TR) of power k+1 = L_hat[rows, :] @ power_k   (bf16 x bf16 -> f32 acc)
    prev = bpow_ref[pl.ds(pl.multiple_of(k * NP, NP), NP), :]           # (NP, hid)
    cur = jnp.dot(l_ref[...], prev, preferred_element_type=f32)         # (TR, hid) f32

    # only powers 1..K-1 are ever re-read from scratch; power K is consumed as `cur` below
    @pl.when(k < K - 1)
    def _():
        bpow_ref[pl.ds(pl.multiple_of((k + 1) * NP + row0, TR), TR), :] = cur.astype(compute_dtype)

    # ---- finalize: all K+1 powers of this row tile available -> filters + attention ----
    @pl.when(k == K - 1)
    def _():
        def power(i):                    # static python index i in 0..K
            if i == K:
                return cur
            return bpow_ref[pl.ds(pl.multiple_of(i * NP + row0, TR), TR), :].astype(f32)

        def h_f(f):                      # h_f = sum_i alpha[f, i] * L_hat^i xh (alpha folded host-side)
            hf = power(0) * alpha_ref[f, 0]
            for i in range(1, K + 1):
                hf = hf + power(i) * alpha_ref[f, i]
            return hf

        xp = jnp.tanh(jnp.dot(power(0), wx_ref[...], preferred_element_type=f32)
                      + bx_ref[...])                                     # (TR, hid)
        bf = bf_ref[...]

        # pass 1: attention logits.  Only F (TR, 1) logits are kept live; h_f is recomputed
        # in pass 2 instead of holding F (TR, hid) tiles.  p_f = h_f @ W_f (linearity) avoids
        # projecting/concatenating all K+1 powers.
        logits = []
        for f in range(F):
            pf = jnp.dot(h_f(f), wf_ref[...], preferred_element_type=f32)
            hproj = jnp.tanh(pf + bf)
            logits.append(jnp.sum(hproj * xp, axis=-1, keepdims=True))   # (TR, 1)

        m = logits[0]
        for f in range(1, F):
            m = jnp.maximum(m, logits[f])
        exps = [jnp.exp(l - m) for l in logits]
        den = exps[0]
        for f in range(1, F):
            den = den + exps[f]
        inv = pl.reciprocal(den, approx=True)        # EUP reciprocal, VALU freed

        # pass 2: softmax-weighted filter mixture
        res = h_f(0) * (exps[0] * inv)
        for f in range(1, F):
            res = res + h_f(f) * (exps[f] * inv)
        res_ref[...] = res.astype(res_ref.dtype)


# ------------------------- kernel 3: res @ res.T (tiled Gram) ----------------------------

def gram_kernel(a_ref, b_ref, o_ref):
    o_ref[...] = jax.lax.dot_general(
        a_ref[...], b_ref[...], dimension_numbers=(((1,), (1,)), ((), ())),
        preferred_element_type=jnp.float32).astype(o_ref.dtype)


# --------------------------------------- wrapper -----------------------------------------

def amnet_forward(x, edge_index, params, K, filter_num):
    assert K >= 1, "BernConv requires K > 0 (a degree-0 grid would never run the finalize)"
    N, in_ch = x.shape
    hid = params["w2"].shape[1]
    cb = jnp.dtype(COMPUTE_DTYPE).itemsize
    hid_p = _round_up(hid, 128)

    vmem_cap = _vmem_capacity_bytes()
    vmem_cap_eff = (vmem_cap // 8) * 7            # leave headroom for Mosaic internals

    NP = _round_up(N, 128)                        # padded node dim (lane/sublane aligned)
    TR = _pick_row_tile(NP, cb, budget=vmem_cap // 10)
    R = NP // TR
    TM = min(512, NP)                             # Gram output tile (multiple of 128)

    # ---- glue: dense scaled sym-normalized Laplacian  L_hat = (I - D^-1/2 A D^-1/2) / lambda_max
    # Built with one scatter into a zeroed COMPUTE_DTYPE (NP, NP) buffer plus a diagonal scatter;
    # degrees via segment_sum over edges.  lambda_max = 2.0 (reference default); self-loop edges
    # removed; inf -> 0 masking as in torch_geometric.get_laplacian('sym').
    src, dst = edge_index[0], edge_index[1]
    w = (src != dst).astype(jnp.float32)                          # remove self loops
    deg = jax.ops.segment_sum(w, src, num_segments=N)
    d_inv_sqrt = jnp.where(deg > 0, jax.lax.rsqrt(deg), 0.0)      # inf -> 0
    vals = (-0.5) * d_inv_sqrt[src] * w * d_inv_sqrt[dst]
    L_hat = jnp.zeros((NP, NP), COMPUTE_DTYPE)
    L_hat = L_hat.at[src, dst].add(vals.astype(COMPUTE_DTYPE))
    diag = jnp.arange(N, dtype=jnp.int32)
    L_hat = L_hat.at[diag, diag].add(0.5)

    x_pad = jnp.pad(x.astype(jnp.float32), ((0, NP - N), (0, 0)))

    # ---- fold sigmoid(filter weights) with Bernstein coefficients host-side:
    #      alpha[f, i] = sum_k sigmoid(fw[f, k]) * bern_coeff[k][i]
    C = jnp.asarray(np.asarray(get_bern_coeff(K), dtype=np.float32))    # (K+1, K+1)
    alpha = jax.nn.sigmoid(params["fw"].astype(jnp.float32)) @ C        # (F, K+1)

    # ---- kernel 1: input transform -------------------------------------------------------
    xh = pl.pallas_call(
        linear_in_kernel,
        out_shape=jax.ShapeDtypeStruct((NP, hid), COMPUTE_DTYPE),
        grid=(R,),
        in_specs=[pl.BlockSpec((TR, in_ch), lambda i: (i, 0)),
                  pl.BlockSpec((in_ch, hid), lambda i: (0, 0)),
                  pl.BlockSpec((1, hid), lambda i: (0, 0)),
                  pl.BlockSpec((hid, hid), lambda i: (0, 0)),
                  pl.BlockSpec((1, hid), lambda i: (0, 0))],
        out_specs=pl.BlockSpec((TR, hid), lambda i: (i, 0)),
        compiler_params=pltpu.CompilerParams(dimension_semantics=("parallel",)),
    )(x_pad, params["w1"], params["b1"], params["w2"], params["b2"])

    # ---- kernel 2: propagation + attention -> res ----------------------------------------
    vmem2 = int(2 * TR * NP * cb              # L slab, double buffered (dominant stream)
                + 2 * NP * hid_p * cb         # xh resident input
                + K * NP * hid_p * cb         # power scratch (powers 0..K-1, COMPUTE_DTYPE)
                + 2 * TR * hid_p * cb         # res out tile
                + (2 << 20))                  # weights + headroom
    vmem2 = min(max(vmem2, 16 << 20), vmem_cap_eff)

    cost2 = pl.CostEstimate(
        flops=int(2 * K * NP * NP * hid
                  + 2 * (filter_num + 1) * NP * hid * hid
                  + 8 * filter_num * (K + 1) * NP * hid),
        transcendentals=int(NP * hid * (filter_num + 1) + NP * filter_num),
        bytes_accessed=int(K * NP * NP * cb + 3 * NP * hid * cb))

    res = pl.pallas_call(
        functools.partial(prop_attn_kernel, K, filter_num, NP, TR, COMPUTE_DTYPE),
        out_shape=jax.ShapeDtypeStruct((NP, hid), COMPUTE_DTYPE),
        grid=(K, R),
        in_specs=[pl.BlockSpec((NP, hid), lambda k, r: (0, 0)),          # xh (VMEM resident)
                  pl.BlockSpec((TR, NP), lambda k, r: (r, 0)),           # L_hat row slab (streamed)
                  pl.BlockSpec(memory_space=pltpu.MemorySpace.SMEM),     # alpha scalars
                  pl.BlockSpec((hid, hid), lambda k, r: (0, 0)),         # wf
                  pl.BlockSpec((1, hid), lambda k, r: (0, 0)),           # bf
                  pl.BlockSpec((hid, hid), lambda k, r: (0, 0)),         # wx
                  pl.BlockSpec((1, hid), lambda k, r: (0, 0))],          # bx
        out_specs=pl.BlockSpec((TR, hid), lambda k, r: (r, 0)),
        scratch_shapes=[pltpu.VMEM((K * NP, hid), COMPUTE_DTYPE)],
        compiler_params=pltpu.CompilerParams(
            # Both axes must stay 'arbitrary': the power axis is a sequential recurrence and
            # the row axis writes a scratch that the *next* power pass reads in full.
            # TODO(synk): a v7x core_map/VMEM_SHARED split of the row axis could use both TCs.
            dimension_semantics=("arbitrary", "arbitrary"),
            vmem_limit_bytes=vmem2),
        cost_estimate=cost2,
    )(xh, L_hat, alpha, params["wf"], params["bf"], params["wx"], params["bx"])

    # ---- kernel 3: res @ res.T written directly into the (N, N) output --------------------
    GR = (N + TM - 1) // TM
    cost3 = pl.CostEstimate(
        flops=int(2 * N * N * hid),
        transcendentals=0,
        bytes_accessed=int(N * N * 4 + 2 * GR * N * hid * cb))

    out = pl.pallas_call(
        gram_kernel,
        out_shape=jax.ShapeDtypeStruct((N, N), jnp.float32),
        grid=(GR, GR),
        in_specs=[pl.BlockSpec((TM, hid), lambda i, j: (i, 0)),
                  pl.BlockSpec((TM, hid), lambda i, j: (j, 0))],
        out_specs=pl.BlockSpec((TM, TM), lambda i, j: (i, j)),           # partial edge blocks masked
        compiler_params=pltpu.CompilerParams(
            dimension_semantics=("parallel", "parallel")),
        cost_estimate=cost3,
    )(res, res)

    return out


if __name__ == "__main__":
    N, in_ch, hid, K, FNUM = 32, 16, 32, 3, 5

    key = jax.random.PRNGKey(0)
    keys = jax.random.split(key, 10)
    x = jax.random.normal(keys[0], (N, in_ch), jnp.float32)

    # deterministic undirected graph: ring + a few chords, both edge directions listed once
    src = np.arange(N)
    dst = (src + 1) % N
    cs = np.arange(0, N // 2, 4)
    cd = cs + N // 2
    rows = np.concatenate([src, dst, cs, cd])
    cols = np.concatenate([dst, src, cd, cs])
    edge_index = jnp.asarray(np.stack([rows, cols]), dtype=jnp.int32)

    s = 0.1
    params = {
        # linear_transform_in
        "w1": s * jax.random.normal(keys[1], (in_ch, hid), jnp.float32),
        "b1": s * jax.random.normal(keys[2], (1, hid), jnp.float32),
        "w2": s * jax.random.normal(keys[3], (hid, hid), jnp.float32),
        "b2": s * jax.random.normal(keys[4], (1, hid), jnp.float32),
        # BernConv per-filter weights (reference zero-inits; random here so filters differ)
        "fw": jax.random.normal(keys[5], (FNUM, K + 1), jnp.float32),
        # W_f / W_x attention projections
        "wf": s * jax.random.normal(keys[6], (hid, hid), jnp.float32),
        "bf": s * jax.random.normal(keys[7], (1, hid), jnp.float32),
        "wx": s * jax.random.normal(keys[8], (hid, hid), jnp.float32),
        "bx": s * jax.random.normal(keys[9], (1, hid), jnp.float32),
    }
    # TODO(synk): BernConv.bias and linear_cls_out/dropout are allocated in __init__ but never
    # used in the reference forward (it returns res @ res.T early), so they are omitted.

    out = amnet_forward(x, edge_index, params, K, FNUM)
    jax.block_until_ready(out)
    assert out.shape == (N, N) and bool(jnp.all(jnp.isfinite(out)))
    print("KERNEL_OK")
</pallas_src>

<mosaic_0001>
module attributes {stable_mosaic.version = 11 : i64} {
  func.func @linear_in_kernel(%arg0: i32, %arg1: memref<128x16xf32, #tpu.memory_space<vmem>>, %arg2: memref<16x32xf32, #tpu.memory_space<vmem>>, %arg3: memref<1x32xf32, #tpu.memory_space<vmem>>, %arg4: memref<32x32xf32, #tpu.memory_space<vmem>>, %arg5: memref<1x32xf32, #tpu.memory_space<vmem>>, %arg6: memref<128x32xbf16, #tpu.memory_space<vmem>>) attributes {dimension_semantics = [#tpu.dimension_semantics<parallel>], iteration_bounds = array<i64: 1>, scalar_prefetch = 0 : i64, scratch_operands = 0 : i64, tpu.core_type = #tpu.core_type<tc>, window_params = [{transform_indices = @transform_0, window_bounds = array<i64: 128, 16>}, {pipeline_mode = #tpu.pipeline_mode<synchronous>, transform_indices = @transform_1, window_bounds = array<i64: 16, 32>}, {pipeline_mode = #tpu.pipeline_mode<synchronous>, transform_indices = @transform_2, window_bounds = array<i64: 1, 32>}, {pipeline_mode = #tpu.pipeline_mode<synchronous>, transform_indices = @transform_3, window_bounds = array<i64: 32, 32>}, {pipeline_mode = #tpu.pipeline_mode<synchronous>, transform_indices = @transform_4, window_bounds = array<i64: 1, 32>}, {transform_indices = @transform_5, window_bounds = array<i64: 128, 32>}]} {
    %c0 = arith.constant 0 : index
    %c0_0 = arith.constant 0 : index
    %0 = vector.load %arg1[%c0, %c0_0] : memref<128x16xf32, #tpu.memory_space<vmem>>, vector<128x16xf32>
    %c0_1 = arith.constant 0 : index
    %c0_2 = arith.constant 0 : index
    %1 = vector.load %arg2[%c0_1, %c0_2] : memref<16x32xf32, #tpu.memory_space<vmem>>, vector<16x32xf32>
    %cst = arith.constant dense<0.000000e+00> : vector<128x32xf32>
    %2 = tpu.matmul %0, %1, %cst {dimension_numbers = #tpu.dot_dimension_numbers<[1], [0], [0], [1], [0, 0, 1, 1], [], []>} : vector<128x16xf32>, vector<16x32xf32>, vector<128x32xf32> -> vector<128x32xf32>
    %c0_3 = arith.constant 0 : index
    %c0_4 = arith.constant 0 : index
    %3 = vector.load %arg3[%c0_3, %c0_4] : memref<1x32xf32, #tpu.memory_space<vmem>>, vector<1x32xf32>
    %4 = vector.broadcast %3 : vector<1x32xf32> to vector<128x32xf32>
    %5 = arith.addf %2, %4 : vector<128x32xf32>
    %cst_5 = arith.constant 0.000000e+00 : f32
    %6 = vector.broadcast %cst_5 : f32 to vector<128x32xf32>
    %7 = arith.maximumf %5, %6 : vector<128x32xf32>
    %c0_6 = arith.constant 0 : index
    %c0_7 = arith.constant 0 : index
    %8 = vector.load %arg4[%c0_6, %c0_7] : memref<32x32xf32, #tpu.memory_space<vmem>>, vector<32x32xf32>
    %cst_8 = arith.constant dense<0.000000e+00> : vector<128x32xf32>
    %9 = tpu.matmul %7, %8, %cst_8 {dimension_numbers = #tpu.dot_dimension_numbers<[1], [0], [0], [1], [0, 0, 1, 1], [], []>} : vector<128x32xf32>, vector<32x32xf32>, vector<128x32xf32> -> vector<128x32xf32>
    %c0_9 = arith.constant 0 : index
    %c0_10 = arith.constant 0 : index
    %10 = vector.load %arg5[%c0_9, %c0_10] : memref<1x32xf32, #tpu.memory_space<vmem>>, vector<1x32xf32>
    %11 = vector.broadcast %10 : vector<1x32xf32> to vector<128x32xf32>
    %12 = arith.addf %9, %11 : vector<128x32xf32>
    %13 = arith.truncf %12 : vector<128x32xf32> to vector<128x32xbf16>
    %c0_11 = arith.constant 0 : index
    %c0_12 = arith.constant 0 : index
    %14 = vector.load %arg6[%c0_11, %c0_12] : memref<128x32xbf16, #tpu.memory_space<vmem>>, vector<128x32xbf16>
    tpu.vector_store %arg6[%c0_11, %c0_12], %13 {strides = array<i32>} : memref<128x32xbf16, #tpu.memory_space<vmem>>, vector<128x32xbf16>,
    return
  }
  func.func @transform_0(%arg0: i32) -> (i32, i32) {
    %c0_i32 = arith.constant 0 : i32
    %c0_i32_0 = arith.constant 0 : i32
    return %arg0, %c0_i32 : i32, i32
  }
  func.func @transform_1(%arg0: i32) -> (i32, i32) {
    %c0_i32 = arith.constant 0 : i32
    %c0_i32_0 = arith.constant 0 : i32
    %c0_i32_1 = arith.constant 0 : i32
    return %c0_i32, %c0_i32_0 : i32, i32
  }
  func.func @transform_2(%arg0: i32) -> (i32, i32) {
    %c0_i32 = arith.constant 0 : i32
    %c0_i32_0 = arith.constant 0 : i32
    %c0_i32_1 = arith.constant 0 : i32
    return %c0_i32, %c0_i32_0 : i32, i32
  }
  func.func @transform_3(%arg0: i32) -> (i32, i32) {
    %c0_i32 = arith.constant 0 : i32
    %c0_i32_0 = arith.constant 0 : i32
    %c0_i32_1 = arith.constant 0 : i32
    return %c0_i32, %c0_i32_0 : i32, i32
  }
  func.func @transform_4(%arg0: i32) -> (i32, i32) {
    %c0_i32 = arith.constant 0 : i32
    %c0_i32_0 = arith.constant 0 : i32
    %c0_i32_1 = arith.constant 0 : i32
    return %c0_i32, %c0_i32_0 : i32, i32
  }
  func.func @transform_5(%arg0: i32) -> (i32, i32) {
    %c0_i32 = arith.constant 0 : i32
    %c0_i32_0 = arith.constant 0 : i32
    return %arg0, %c0_i32 : i32, i32
  }
}

</mosaic_0001>

<bundles_post_ra>
// kernel: tpu_custom_call.1
= control target key start
LH: loop header
LB: loop body
LE: loop exit
PB: predicated region body
PF: predicated region fallthrough
CT: control target
= control target key end

     0   :  { %vm42_vm0 = vcmask 130048   ;;  %vm180_vm1 = vcmask 261120   ;;  %vm310_vm2 = vcmask 257024   ;;  %s605_s1 = inlined_call_operand.vmem [shape: f32[16,32], index: 1, kind: input, shape index: {}]   ;;  %s606_s0 = inlined_call_operand.vmem [shape: f32[128,16], index: 0, kind: input, shape index: {}]   ;;  %s607_s2 = inlined_call_operand.vmem [shape: f32[1,32], index: 2, kind: input, shape index: {}]   ;;  %s608_s3 = inlined_call_operand.vmem [shape: f32[32,32], index: 3, kind: input, shape index: {}]   ;;  %s609_s4 = inlined_call_operand.vmem [shape: f32[1,32], index: 4, kind: input, shape index: {}]   ;;  %s610_s5 = inlined_call_operand.vmem [shape: bf16[128,32], index: 5, kind: output, shape index: {}]  }
   0x1   :  { %v37_v0 = vld [vmem:[%s605_s1 + $0x8] sm:$0xff]  ;;  %v36_v1 = vld [vmem:[%s605_s1] sm:$0xff]  ;;  %v22_v4 = vld [vmem:[%s606_s0 + $0x10] sm:$0xff] }
   0x2   :  { %105 = vmatpush.msra.mxu0 %v37_v0  ;;  %v20_v2 = vld [vmem:[%s606_s0] sm:$0xff]  ;;  %363 = vmatpush.msra.mxu3 %v37_v0  ;;  %v21_v3 = vld [vmem:[%s606_s0 + $0x8] sm:$0xff]  ;;  %v23_v5 = vld [vmem:[%s606_s0 + $0x18] sm:$0xff] }
   0x3   :  { %v24_v6 = vld [vmem:[%s606_s0 + $0x20] sm:$0xff]  ;;  %v29_v7 = vld [vmem:[%s606_s0 + $0x48] sm:$0xff]  ;;  %v30_v9 = vld [vmem:[%s606_s0 + $0x50] sm:$0xff] }
   0x4   :  { %106 = vmatpush.msra.mxu0 %v36_v1  ;;  %364 = vmatpush.msra.mxu3 %v36_v1  ;;  %v25_v8 = vld [vmem:[%s606_s0 + $0x28] sm:$0xff]  ;;  %v26_v10 = vld [vmem:[%s606_s0 + $0x30] sm:$0xff]  ;;  %v31_v11 = vld [vmem:[%s606_s0 + $0x58] sm:$0xff] }
   0x5   :  { %331 = vmatmul.msk.f32.vlgmr.msra.gmra.mxu0 %vm42_vm0, %v20_v2  ;;  %340 = vmatmul.msk.f32.vlgmr.msra.gmra.mxu3 %vm42_vm0, %v29_v7  ;;  %v175_v12 = vld [vmem:[%s608_s3 + $0x18] sm:$0xff]  ;;  %v32_v14 = vld [vmem:[%s606_s0 + $0x60] sm:$0xff]  ;;  %v33_v16 = vld [vmem:[%s606_s0 + $0x68] sm:$0xff] }
   0x6   :  { %241 = vmatpush.msra.mxu1 %v175_v12  ;;  %365 = vmatpush.msra.mxu2 %v175_v12  ;;  %v27_v13 = vld [vmem:[%s606_s0 + $0x38] sm:$0xff]  ;;  %v28_v15 = vld [vmem:[%s606_s0 + $0x40] sm:$0xff]  ;;  %v34_v17 = vld [vmem:[%s606_s0 + $0x70] sm:$0xff] }
   0x7   :  { %v35_v18 = vld [vmem:[%s606_s0 + $0x78] sm:$0xff]  ;;  %v174_v19 = vld [vmem:[%s608_s3 + $0x10] sm:$0xff]  ;;  %v173_v20 = vld [vmem:[%s608_s3 + $0x8] sm:$0xff] }
   0x8   :  { %242 = vmatpush.msra.mxu1 %v174_v19  ;;  %366 = vmatpush.msra.mxu2 %v174_v19  ;;  %v172_v21 = vld [vmem:[%s608_s3] sm:$0xff] }
   0x9   :  { %v486_v22 = vld [vmem:[%s607_s2] ss:$0 sm:$0xff] }
   0xa   :  { %243 = vmatpush.msra.mxu1 %v173_v20  ;;  %367 = vmatpush.msra.mxu2 %v173_v20  ;;  %v523_v7 = vld [vmem:[%s609_s4] ss:$0 sm:$0xff] }
   0xc   :  { %244 = vmatpush.msra.mxu1 %v172_v21  ;;  %368 = vmatpush.msra.mxu2 %v172_v21 }
   0xd   :  { %332 = vmatmul.msk.f32.gmra.mxu0 %vm42_vm0, %v21_v3  ;;  %341 = vmatmul.msk.f32.gmra.mxu3 %vm42_vm0, %v30_v9 }
  0x15   :  { %333 = vmatmul.msk.f32.gmra.mxu0 %vm42_vm0, %v22_v4  ;;  %342 = vmatmul.msk.f32.gmra.mxu3 %vm42_vm0, %v31_v11 }
  0x1d   :  { %334 = vmatmul.msk.f32.gmra.mxu0 %vm42_vm0, %v23_v5  ;;  %343 = vmatmul.msk.f32.gmra.mxu3 %vm42_vm0, %v32_v14 }
  0x25   :  { %335 = vmatmul.msk.f32.gmra.mxu0 %vm42_vm0, %v24_v6  ;;  %344 = vmatmul.msk.f32.gmra.mxu3 %vm42_vm0, %v33_v16 }
  0x2d   :  { %336 = vmatmul.msk.f32.gmra.mxu0 %vm42_vm0, %v25_v8  ;;  %345 = vmatmul.msk.f32.gmra.mxu3 %vm42_vm0, %v34_v17 }
  0x35   :  { %337 = vmatmul.msk.f32.gmra.mxu0 %vm42_vm0, %v26_v10  ;;  %346 = vmatmul.msk.f32.gmra.mxu3 %vm42_vm0, %v35_v18 }
  0x3d   :  { %338 = vmatmul.msk.f32.gmra.mxu0 %vm42_vm0, %v27_v13 }
  0x45   :  { %339 = vmatmul.msk.f32.gmra.mxu0 %vm42_vm0, %v28_v15 }
  0x82   :  { %v108_v23 = vpop.f32.mrf.mxu0 }
  0x83   :  { %v109_v24 = vadd.f32 %v486_v22, %v108_v23 }
  0x85   :  { %v156_v25 = vmax.f32 %v109_v24, 0.0 }
  0x87   :  { %347 = vmatmul.msk.f32.vlgmr.msra.gmra.mxu1 %vm180_vm1, %v156_v25 }
  0x88   :  { %v135_v44 = vpop.f32.mrf.mxu3 }
  0x89   :  { %v136_v52 = vadd.f32 %v486_v22, %v135_v44 }
  0x8a   :  { %v111_v26 = vpop.f32.mrf.mxu0 }
  0x8b   :  { %v112_v27 = vadd.f32 %v486_v22, %v111_v26  ;;  %v165_v53 = vmax.f32 %v136_v52, 0.0 }
  0x8d   :  { %v157_v28 = vmax.f32 %v112_v27, 0.0 }
  0x8f   :  { %348 = vmatmul.msk.f32.gmra.mxu1 %vm180_vm1, %v157_v28 }
  0x90   :  { %v138_v49 = vpop.f32.mrf.mxu3 }
  0x91   :  { %v139_v55 = vadd.f32 %v486_v22, %v138_v49 }
  0x92   :  { %v114_v29 = vpop.f32.mrf.mxu0 }
  0x93   :  { %v115_v30 = vadd.f32 %v486_v22, %v114_v29  ;;  %v166_v56 = vmax.f32 %v139_v55, 0.0 }
  0x95   :  { %v158_v31 = vmax.f32 %v115_v30, 0.0 }
  0x97   :  { %349 = vmatmul.msk.f32.gmra.mxu1 %vm180_vm1, %v158_v31 }
  0x98   :  { %v141_v54 = vpop.f32.mrf.mxu3 }
  0x99   :  { %v142_v58 = vadd.f32 %v486_v22, %v141_v54 }
  0x9a   :  { %v117_v32 = vpop.f32.mrf.mxu0 }
  0x9b   :  { %v118_v33 = vadd.f32 %v486_v22, %v117_v32  ;;  %v167_v59 = vmax.f32 %v142_v58, 0.0 }
  0x9d   :  { %v159_v34 = vmax.f32 %v118_v33, 0.0 }
  0x9f   :  { %350 = vmatmul.msk.f32.gmra.mxu1 %vm180_vm1, %v159_v34 }
  0xa0   :  { %v144_v57 = vpop.f32.mrf.mxu3 }
  0xa1   :  { %v145_v60 = vadd.f32 %v486_v22, %v144_v57 }
  0xa2   :  { %v120_v35 = vpop.f32.mrf.mxu0 }
  0xa3   :  { %v121_v36 = vadd.f32 %v486_v22, %v120_v35  ;;  %v168_v62 = vmax.f32 %v145_v60, 0.0 }
  0xa5   :  { %v160_v37 = vmax.f32 %v121_v36, 0.0 }
  0xa7   :  { %351 = vmatmul.msk.f32.gmra.mxu1 %vm180_vm1, %v160_v37 }
  0xa8   :  { %v147_v61 = vpop.f32.mrf.mxu3 }
  0xa9   :  { %v148_v63 = vadd.f32 %v486_v22, %v147_v61 }
  0xaa   :  { %v123_v38 = vpop.f32.mrf.mxu0 }
  0xab   :  { %v124_v39 = vadd.f32 %v486_v22, %v123_v38  ;;  %v169_v1 = vmax.f32 %v148_v63, 0.0 }
  0xad   :  { %v161_v40 = vmax.f32 %v124_v39, 0.0 }
  0xaf   :  { %352 = vmatmul.msk.f32.gmra.mxu1 %vm180_vm1, %v161_v40 }
  0xb0   :  { %v150_v0 = vpop.f32.mrf.mxu3 }
  0xb1   :  { %v151_v2 = vadd.f32 %v486_v22, %v150_v0 }
  0xb2   :  { %v126_v41 = vpop.f32.mrf.mxu0 }
  0xb3   :  { %v127_v42 = vadd.f32 %v486_v22, %v126_v41  ;;  %v170_v3 = vmax.f32 %v151_v2, 0.0 }
  0xb5   :  { %v162_v43 = vmax.f32 %v127_v42, 0.0 }
  0xb7   :  { %353 = vmatmul.msk.f32.gmra.mxu1 %vm180_vm1, %v162_v43 }
  0xb8   :  { %v153_v4 = vpop.f32.mrf.mxu3 }
  0xb9   :  { %v154_v5 = vadd.f32 %v486_v22, %v153_v4 }
  0xba   :  { %v129_v45 = vpop.f32.mrf.mxu0 }
  0xbb   :  { %v130_v46 = vadd.f32 %v486_v22, %v129_v45  ;;  %v171_v6 = vmax.f32 %v154_v5, 0.0 }
  0xbd   :  { %v163_v47 = vmax.f32 %v130_v46, 0.0 }
  0xbf   :  { %354 = vmatmul.msk.f32.gmra.mxu1 %vm180_vm1, %v163_v47 }
  0xc2   :  { %v132_v48 = vpop.f32.mrf.mxu0 }
  0xc3   :  { %v133_v50 = vadd.f32 %v486_v22, %v132_v48 }
  0xc5   :  { %v164_v51 = vmax.f32 %v133_v50, 0.0 }
  0xc7   :  { %355 = vmatmul.msk.f32.vlgmr.msra.gmra.mxu2 %vm180_vm1, %v164_v51 }
  0xcf   :  { %356 = vmatmul.msk.f32.gmra.mxu2 %vm180_vm1, %v165_v53 }
  0xd7   :  { %357 = vmatmul.msk.f32.gmra.mxu2 %vm180_vm1, %v166_v56 }
  0xdf   :  { %358 = vmatmul.msk.f32.gmra.mxu2 %vm180_vm1, %v167_v59 }
  0xe7   :  { %359 = vmatmul.msk.f32.gmra.mxu2 %vm180_vm1, %v168_v62 }
  0xef   :  { %360 = vmatmul.msk.f32.gmra.mxu2 %vm180_vm1, %v169_v1 }
  0xf7   :  { %361 = vmatmul.msk.f32.gmra.mxu2 %vm180_vm1, %v170_v3 }
  0xff   :  { %362 = vmatmul.msk.f32.gmra.mxu2 %vm180_vm1, %v171_v6 }
 0x104   :  { %v246_v8 = vpop.f32.mrf.mxu1 }
 0x105   :  { %v247_v9 = vadd.f32 %v523_v7, %v246_v8 }
 0x107   :  { %v294_v10 = vpack.c.bf16 %v247_v9, %v247_v9 }
 0x109   :  { %311 = vst.msk [vmem:[%s610_s5] sm:$0xf] %vm310_vm2, %v294_v10 }
 0x10c   :  { %v249_v11 = vpop.f32.mrf.mxu1 }
 0x10d   :  { %v250_v12 = vadd.f32 %v523_v7, %v249_v11 }
 0x10f   :  { %v295_v13 = vpack.c.bf16 %v250_v12, %v250_v12 }
 0x111   :  { %312 = vst.msk [vmem:[%s610_s5 + $0x4] sm:$0xf] %vm310_vm2, %v295_v13 }
 0x114   :  { %v252_v14 = vpop.f32.mrf.mxu1 }
 0x115   :  { %v253_v15 = vadd.f32 %v523_v7, %v252_v14 }
 0x117   :  { %v296_v16 = vpack.c.bf16 %v253_v15, %v253_v15 }
 0x119   :  { %313 = vst.msk [vmem:[%s610_s5 + $0x8] sm:$0xf] %vm310_vm2, %v296_v16 }
 0x11c   :  { %v255_v17 = vpop.f32.mrf.mxu1 }
 0x11d   :  { %v256_v18 = vadd.f32 %v523_v7, %v255_v17 }
 0x11f   :  { %v297_v19 = vpack.c.bf16 %v256_v18, %v256_v18 }
 0x121   :  { %314 = vst.msk [vmem:[%s610_s5 + $0xc] sm:$0xf] %vm310_vm2, %v297_v19 }
 0x124   :  { %v258_v20 = vpop.f32.mrf.mxu1 }
 0x125   :  { %v259_v21 = vadd.f32 %v523_v7, %v258_v20 }
 0x127   :  { %v298_v22 = vpack.c.bf16 %v259_v21, %v259_v21 }
 0x129   :  { %315 = vst.msk [vmem:[%s610_s5 + $0x10] sm:$0xf] %vm310_vm2, %v298_v22 }
 0x12c   :  { %v261_v23 = vpop.f32.mrf.mxu1 }
 0x12d   :  { %v262_v24 = vadd.f32 %v523_v7, %v261_v23 }
 0x12f   :  { %v299_v25 = vpack.c.bf16 %v262_v24, %v262_v24 }
 0x131   :  { %316 = vst.msk [vmem:[%s610_s5 + $0x14] sm:$0xf] %vm310_vm2, %v299_v25 }
 0x134   :  { %v264_v26 = vpop.f32.mrf.mxu1 }
 0x135   :  { %v265_v27 = vadd.f32 %v523_v7, %v264_v26 }
 0x137   :  { %v300_v28 = vpack.c.bf16 %v265_v27, %v265_v27 }
 0x139   :  { %317 = vst.msk [vmem:[%s610_s5 + $0x18] sm:$0xf] %vm310_vm2, %v300_v28 }
 0x13c   :  { %v267_v29 = vpop.f32.mrf.mxu1 }
 0x13d   :  { %v268_v30 = vadd.f32 %v523_v7, %v267_v29 }
 0x13f   :  { %v301_v31 = vpack.c.bf16 %v268_v30, %v268_v30 }
 0x141   :  { %318 = vst.msk [vmem:[%s610_s5 + $0x1c] sm:$0xf] %vm310_vm2, %v301_v31 }
 0x14a   :  { %v270_v32 = vpop.f32.mrf.mxu2 }
 0x14b   :  { %v271_v33 = vadd.f32 %v523_v7, %v270_v32 }
 0x14d   :  { %v302_v34 = vpack.c.bf16 %v271_v33, %v271_v33 }
 0x14f   :  { %319 = vst.msk [vmem:[%s610_s5 + $0x20] sm:$0xf] %vm310_vm2, %v302_v34 }
 0x152   :  { %v273_v35 = vpop.f32.mrf.mxu2 }
 0x153   :  { %v274_v36 = vadd.f32 %v523_v7, %v273_v35 }
 0x155   :  { %v303_v37 = vpack.c.bf16 %v274_v36, %v274_v36 }
 0x157   :  { %320 = vst.msk [vmem:[%s610_s5 + $0x24] sm:$0xf] %vm310_vm2, %v303_v37 }
 0x15a   :  { %v276_v38 = vpop.f32.mrf.mxu2 }
 0x15b   :  { %v277_v39 = vadd.f32 %v523_v7, %v276_v38 }
 0x15d   :  { %v304_v40 = vpack.c.bf16 %v277_v39, %v277_v39 }
 0x15f   :  { %321 = vst.msk [vmem:[%s610_s5 + $0x28] sm:$0xf] %vm310_vm2, %v304_v40 }
 0x162   :  { %v279_v41 = vpop.f32.mrf.mxu2 }
 0x163   :  { %v280_v42 = vadd.f32 %v523_v7, %v279_v41 }
 0x165   :  { %v305_v43 = vpack.c.bf16 %v280_v42, %v280_v42 }
 0x167   :  { %322 = vst.msk [vmem:[%s610_s5 + $0x2c] sm:$0xf] %vm310_vm2, %v305_v43 }
 0x16a   :  { %v282_v44 = vpop.f32.mrf.mxu2 }
 0x16b   :  { %v283_v45 = vadd.f32 %v523_v7, %v282_v44 }
 0x16d   :  { %v306_v46 = vpack.c.bf16 %v283_v45, %v283_v45 }
 0x16f   :  { %323 = vst.msk [vmem:[%s610_s5 + $0x30] sm:$0xf] %vm310_vm2, %v306_v46 }
 0x172   :  { %v285_v47 = vpop.f32.mrf.mxu2 }
 0x173   :  { %v286_v48 = vadd.f32 %v523_v7, %v285_v47 }
 0x175   :  { %v307_v49 = vpack.c.bf16 %v286_v48, %v286_v48 }
 0x177   :  { %324 = vst.msk [vmem:[%s610_s5 + $0x34] sm:$0xf] %vm310_vm2, %v307_v49 }
 0x17a   :  { %v288_v50 = vpop.f32.mrf.mxu2 }
 0x17b   :  { %v289_v51 = vadd.f32 %v523_v7, %v288_v50 }
 0x17d   :  { %v308_v52 = vpack.c.bf16 %v289_v51, %v289_v51 }
 0x17f   :  { %325 = vst.msk [vmem:[%s610_s5 + $0x38] sm:$0xf] %vm310_vm2, %v308_v52 }
 0x182   :  { %v291_v53 = vpop.f32.mrf.mxu2 }
 0x183   :  { %v292_v54 = vadd.f32 %v523_v7, %v291_v53 }
 0x185   :  { %v309_v55 = vpack.c.bf16 %v292_v54, %v292_v54 }
 0x187   :  { %326 = vst.msk [vmem:[%s610_s5 + $0x3c] sm:$0xf] %vm310_vm2, %v309_v55 }

</bundles_post_ra>
